<compile_context>
chip_gen: v5e
topology: v5e:2x2
jax: 0.10.0
libtpu: 0.0.40
codegen_flags: <defaults>
</compile_context>

<pallas_src>
import numpy as np
import jax
import jax.numpy as jnp
from jax.experimental import pallas as pl
from jax.experimental.pallas import tpu as pltpu


def _round_up(x, m):
    return ((x + m - 1) // m) * m


def _masked_fm_kernel(x_ref, table_ref, o_ref):
    # x_ref:     (F, TB)   int32    batch tile of feature indices (lane-dense)
    # table_ref: (2D, N)   f32/bf16 [masked_table^T ; (masked_table^2)^T]
    # o_ref:     (1, TB)   f32      lane-dense logits row for this tile
    f, tb = x_ref.shape
    d2, n = table_ref.shape
    d = d2 // 2

    # Multi-hot counts: counts[j, b] = #{ field ff : x[ff, b] == j }.
    # (N, 1) iota broadcast against lane-dense (1, TB) index rows -> fully
    # dense vregs; F is small & static so the loop is unrolled VPU work.
    iota_n = jax.lax.broadcasted_iota(jnp.int32, (n, 1), 0)          # (N, 1)
    counts = jnp.zeros((n, tb), dtype=jnp.float32)
    for ff in range(f):
        row = x_ref[ff:ff + 1, :]                                    # (1, TB)
        counts = counts + (iota_n == row).astype(jnp.float32)

    # One MXU matmul gives both sum_f(xe) and sum_f(xe^2).
    # Counts are exact small integers; cast to the table dtype only here
    # (keeps f32 accumulation on v5e's no-bf16 VPU).
    fused = jnp.dot(table_ref[...], counts.astype(table_ref.dtype),
                    preferred_element_type=jnp.float32)              # (2D, TB)

    sum_f = fused[:d, :]                                             # (D, TB), sublane-aligned split
    sum_sq = fused[d:, :]                                            # (D, TB)
    ix = sum_f * sum_f - sum_sq                                      # (D, TB)
    o_ref[...] = 0.5 * jnp.sum(ix, axis=0, keepdims=True)            # (1, TB) lane-dense store


def _pick_tiling(B, F, N, D, table_elt_bytes):
    """Generation-aware batch tile + vmem limit."""
    try:
        info = pltpu.get_tpu_info()
        vmem_cap = int(getattr(info, "vmem_capacity_bytes", 64 << 20))
    except Exception:
        vmem_cap = 64 << 20                      # conservative fallback (v7x per-core VMEM)
    budget = int(0.75 * vmem_cap)                # headroom for Mosaic internal scratch

    d2 = 2 * D
    # Resident fused table (lane-padded); budget conservatively assumes double
    # buffering in case the Buffered(1) request is unavailable.
    table_bytes = _round_up(d2, 8) * _round_up(N, 128) * table_elt_bytes

    def tile_bytes(tb):
        x_buf = 2 * _round_up(F, 8) * tb * 4          # int32 x tile, double buffered
        out_buf = 2 * 8 * tb * 4                      # (1, tb) f32 out, sublane padded
        counts = _round_up(N, 8) * tb * 4             # f32 multi-hot intermediate
        fused = _round_up(d2, 8) * tb * 4             # f32 matmul result
        return x_buf + out_buf + counts + fused

    if 2 * table_bytes + tile_bytes(128) > budget:
        # TODO(synk): fall back to an HBM-resident table + DMA row-gather kernel here.
        raise NotImplementedError(
            "MaskedFM multi-hot kernel needs the fused (2D, N) table + a 128-row "
            "batch tile to fit in VMEM; N=%d, D=%d exceeds the %d-byte budget." %
            (N, D, budget))

    # Largest tile that fits the budget and is not bigger than the padded batch.
    tb = 128
    b_cap = max(128, _round_up(B, 128))
    for cand in (256, 512, 1024, 2048):
        if cand <= b_cap and 2 * table_bytes + tile_bytes(cand) <= budget:
            tb = cand
    # Keep >= 2 grid steps when the batch allows it: shards the 'parallel' axis
    # across both v7x TensorCores and enables DMA pipelining elsewhere.
    if B >= 256:
        tb = min(tb, _round_up((B + 1) // 2, 128))

    need = 2 * table_bytes + tile_bytes(tb)
    vmem_limit = int(min(budget, max(4 * need, 32 << 20)))
    return tb, vmem_limit


def masked_fm_forward(x, embedding, mask_weight, *, mask_initial_value=0.0,
                      temp=1.0, batch_tile=None, mxu_dtype=jnp.float32):
    """x: (B, F) int; embedding: (N, D) f32; mask_weight: (N, 1) f32 -> (B, 1) f32."""
    B, F = x.shape
    N, D = embedding.shape
    D2 = 2 * D

    # --- fold the mask into the table once (amortized over the whole batch) ---
    scaling = float(1.0 / (1.0 / (1.0 + np.exp(-mask_initial_value))))   # 1/sigmoid(init)
    masked = embedding * (scaling * jax.nn.sigmoid(temp * mask_weight))  # (N, D)
    # Transposed fused table: rows [0:D) = masked^T, rows [D:2D) = (masked^2)^T.
    # Squares computed in f32 before any (optional) bf16 cast.
    table_t = jnp.concatenate([masked.T, (masked * masked).T],
                              axis=0).astype(mxu_dtype)                  # (2D, N)

    # --- generation-aware batch tiling & VMEM budget ---
    if batch_tile is None:
        tb, vmem_limit = _pick_tiling(B, F, N, D, jnp.dtype(mxu_dtype).itemsize)
    else:
        tb = _round_up(batch_tile, 128)
        _, vmem_limit = _pick_tiling(B, F, N, D, jnp.dtype(mxu_dtype).itemsize)
    Bp = _round_up(B, tb)
    num_tiles = Bp // tb

    # Field-major, lane-dense index tile; padded rows reuse index 0 and are sliced off.
    x_t = jnp.pad(jnp.asarray(x, jnp.int32).T, ((0, 0), (0, Bp - B)))    # (F, Bp)

    x_spec = pl.BlockSpec((F, tb), lambda i: (0, i))
    out_spec = pl.BlockSpec((1, tb), lambda i: (0, i))

    def run(table_spec):
        return pl.pallas_call(
            _masked_fm_kernel,
            out_shape=jax.ShapeDtypeStruct((1, Bp), jnp.float32),
            grid=(num_tiles,),
            in_specs=[x_spec, table_spec],
            out_specs=out_spec,
            compiler_params=pltpu.CompilerParams(
                dimension_semantics=("parallel",),
                vmem_limit_bytes=vmem_limit),
        )(x_t, table_t)

    try:
        # Resident table (constant index_map): a single VMEM buffer is enough;
        # default double-buffering would just waste VMEM (matters most on v7x).
        out = run(pl.BlockSpec((D2, N), lambda i: (0, 0),
                               pipeline_mode=pl.Buffered(buffer_count=1)))
    except Exception:
        # Fallback for jax versions without BlockSpec pipeline_mode support.
        out = run(pl.BlockSpec((D2, N), lambda i: (0, 0)))

    return out.reshape(Bp)[:B].reshape(B, 1)


def masked_fm_reference(x, embedding, mask_weight, *, mask_initial_value=0.0, temp=1.0):
    scaling = 1.0 / (1.0 / (1.0 + np.exp(-mask_initial_value)))
    embed = embedding[x]                       # (B, F, D)
    mw = mask_weight[x]                        # (B, F, 1)
    mask = scaling * jax.nn.sigmoid(temp * mw)
    xe = embed * mask
    sum_f = jnp.sum(xe, axis=1)
    ix = sum_f ** 2 - jnp.sum(xe ** 2, axis=1)
    return 0.5 * jnp.sum(ix, axis=1, keepdims=True)


if __name__ == "__main__":
    # Module hyperparameters (opt dict): feat_num, latent_dim, field_num, mask_initial.
    feature_num = 64
    latent_dim = 32
    field_num = 8
    batch = 4
    mask_initial = 0.3
    temp = 1.0

    key = jax.random.PRNGKey(0)
    k_emb, k_x = jax.random.split(key)

    # Deterministic parameter init (matches shapes in MaskEmbedding.__init__):
    #   embedding ~ xavier_uniform((feature_num, latent_dim))
    #   mask_weight = const(mask_initial, (feature_num, 1))
    bound = float(np.sqrt(6.0 / (feature_num + latent_dim)))
    embedding = jax.random.uniform(
        k_emb, (feature_num, latent_dim), jnp.float32, minval=-bound, maxval=bound)
    mask_weight = jnp.full((feature_num, 1), mask_initial, dtype=jnp.float32)

    # Integer feature indices, one per field.
    x = jax.random.randint(k_x, (batch, field_num), 0, feature_num, dtype=jnp.int32)

    # f32 MXU path (default): must match the reference tightly.
    out = masked_fm_forward(x, embedding, mask_weight,
                            mask_initial_value=mask_initial, temp=temp)
    out = jax.block_until_ready(out)
    ref = masked_fm_reference(x, embedding, mask_weight,
                              mask_initial_value=mask_initial, temp=temp)
    np.testing.assert_allclose(np.asarray(out), np.asarray(ref), rtol=1e-5, atol=1e-5)

    # bf16 MXU-operand path (opt-in, per perf review): loose tolerance because
    # of the sum_f^2 - sum_sq cancellation in reduced precision.
    out_bf16 = masked_fm_forward(x, embedding, mask_weight,
                                 mask_initial_value=mask_initial, temp=temp,
                                 mxu_dtype=jnp.bfloat16)
    out_bf16 = jax.block_until_ready(out_bf16)
    np.testing.assert_allclose(np.asarray(out_bf16), np.asarray(ref), rtol=0.1, atol=0.1)

    print("KERNEL_OK")
</pallas_src>

<mosaic_0001>
module attributes {stable_mosaic.version = 11 : i64} {
  func.func @_masked_fm_kernel(%arg0: i32, %arg1: memref<8x128xi32, #tpu.memory_space<vmem>>, %arg2: memref<64x64xf32, #tpu.memory_space<vmem>>, %arg3: memref<1x128xf32, #tpu.memory_space<vmem>>) attributes {dimension_semantics = [#tpu.dimension_semantics<parallel>], iteration_bounds = array<i64: 1>, scalar_prefetch = 0 : i64, scratch_operands = 0 : i64, tpu.core_type = #tpu.core_type<tc>, window_params = [{transform_indices = @transform_0, window_bounds = array<i64: 8, 128>}, {pipeline_mode = #tpu.pipeline_mode<synchronous>, transform_indices = @transform_1, window_bounds = array<i64: 64, 64>}, {transform_indices = @transform_2, window_bounds = array<i64: 1, 128>}]} {
    %0 = tpu.iota {dimensions = array<i32: 0>} : vector<64x1xi32>
    %cst = arith.constant 0.000000e+00 : f32
    %1 = vector.broadcast %cst : f32 to vector<64x128xf32>
    %c0 = arith.constant 0 : index
    %c0_0 = arith.constant 0 : index
    %2 = vector.load %arg1[%c0, %c0_0] : memref<8x128xi32, #tpu.memory_space<vmem>>, vector<1x128xi32>
    %3 = vector.broadcast %0 : vector<64x1xi32> to vector<64x128xi32>
    %4 = vector.broadcast %2 : vector<1x128xi32> to vector<64x128xi32>
    %5 = arith.cmpi eq, %3, %4 : vector<64x128xi32>
    %6 = arith.extui %5 : vector<64x128xi1> to vector<64x128xi32>
    %7 = arith.sitofp %6 : vector<64x128xi32> to vector<64x128xf32>
    %8 = arith.addf %1, %7 : vector<64x128xf32>
    %c1 = arith.constant 1 : index
    %c0_1 = arith.constant 0 : index
    %9 = vector.load %arg1[%c1, %c0_1] : memref<8x128xi32, #tpu.memory_space<vmem>>, vector<1x128xi32>
    %10 = vector.broadcast %0 : vector<64x1xi32> to vector<64x128xi32>
    %11 = vector.broadcast %9 : vector<1x128xi32> to vector<64x128xi32>
    %12 = arith.cmpi eq, %10, %11 : vector<64x128xi32>
    %13 = arith.extui %12 : vector<64x128xi1> to vector<64x128xi32>
    %14 = arith.sitofp %13 : vector<64x128xi32> to vector<64x128xf32>
    %15 = arith.addf %8, %14 : vector<64x128xf32>
    %c2 = arith.constant 2 : index
    %c0_2 = arith.constant 0 : index
    %16 = vector.load %arg1[%c2, %c0_2] : memref<8x128xi32, #tpu.memory_space<vmem>>, vector<1x128xi32>
    %17 = vector.broadcast %0 : vector<64x1xi32> to vector<64x128xi32>
    %18 = vector.broadcast %16 : vector<1x128xi32> to vector<64x128xi32>
    %19 = arith.cmpi eq, %17, %18 : vector<64x128xi32>
    %20 = arith.extui %19 : vector<64x128xi1> to vector<64x128xi32>
    %21 = arith.sitofp %20 : vector<64x128xi32> to vector<64x128xf32>
    %22 = arith.addf %15, %21 : vector<64x128xf32>
    %c3 = arith.constant 3 : index
    %c0_3 = arith.constant 0 : index
    %23 = vector.load %arg1[%c3, %c0_3] : memref<8x128xi32, #tpu.memory_space<vmem>>, vector<1x128xi32>
    %24 = vector.broadcast %0 : vector<64x1xi32> to vector<64x128xi32>
    %25 = vector.broadcast %23 : vector<1x128xi32> to vector<64x128xi32>
    %26 = arith.cmpi eq, %24, %25 : vector<64x128xi32>
    %27 = arith.extui %26 : vector<64x128xi1> to vector<64x128xi32>
    %28 = arith.sitofp %27 : vector<64x128xi32> to vector<64x128xf32>
    %29 = arith.addf %22, %28 : vector<64x128xf32>
    %c4 = arith.constant 4 : index
    %c0_4 = arith.constant 0 : index
    %30 = vector.load %arg1[%c4, %c0_4] : memref<8x128xi32, #tpu.memory_space<vmem>>, vector<1x128xi32>
    %31 = vector.broadcast %0 : vector<64x1xi32> to vector<64x128xi32>
    %32 = vector.broadcast %30 : vector<1x128xi32> to vector<64x128xi32>
    %33 = arith.cmpi eq, %31, %32 : vector<64x128xi32>
    %34 = arith.extui %33 : vector<64x128xi1> to vector<64x128xi32>
    %35 = arith.sitofp %34 : vector<64x128xi32> to vector<64x128xf32>
    %36 = arith.addf %29, %35 : vector<64x128xf32>
    %c5 = arith.constant 5 : index
    %c0_5 = arith.constant 0 : index
    %37 = vector.load %arg1[%c5, %c0_5] : memref<8x128xi32, #tpu.memory_space<vmem>>, vector<1x128xi32>
    %38 = vector.broadcast %0 : vector<64x1xi32> to vector<64x128xi32>
    %39 = vector.broadcast %37 : vector<1x128xi32> to vector<64x128xi32>
    %40 = arith.cmpi eq, %38, %39 : vector<64x128xi32>
    %41 = arith.extui %40 : vector<64x128xi1> to vector<64x128xi32>
    %42 = arith.sitofp %41 : vector<64x128xi32> to vector<64x128xf32>
    %43 = arith.addf %36, %42 : vector<64x128xf32>
    %c6 = arith.constant 6 : index
    %c0_6 = arith.constant 0 : index
    %44 = vector.load %arg1[%c6, %c0_6] : memref<8x128xi32, #tpu.memory_space<vmem>>, vector<1x128xi32>
    %45 = vector.broadcast %0 : vector<64x1xi32> to vector<64x128xi32>
    %46 = vector.broadcast %44 : vector<1x128xi32> to vector<64x128xi32>
    %47 = arith.cmpi eq, %45, %46 : vector<64x128xi32>
    %48 = arith.extui %47 : vector<64x128xi1> to vector<64x128xi32>
    %49 = arith.sitofp %48 : vector<64x128xi32> to vector<64x128xf32>
    %50 = arith.addf %43, %49 : vector<64x128xf32>
    %c7 = arith.constant 7 : index
    %c0_7 = arith.constant 0 : index
    %51 = vector.load %arg1[%c7, %c0_7] : memref<8x128xi32, #tpu.memory_space<vmem>>, vector<1x128xi32>
    %52 = vector.broadcast %0 : vector<64x1xi32> to vector<64x128xi32>
    %53 = vector.broadcast %51 : vector<1x128xi32> to vector<64x128xi32>
    %54 = arith.cmpi eq, %52, %53 : vector<64x128xi32>
    %55 = arith.extui %54 : vector<64x128xi1> to vector<64x128xi32>
    %56 = arith.sitofp %55 : vector<64x128xi32> to vector<64x128xf32>
    %57 = arith.addf %50, %56 : vector<64x128xf32>
    %c0_8 = arith.constant 0 : index
    %c0_9 = arith.constant 0 : index
    %58 = vector.load %arg2[%c0_8, %c0_9] : memref<64x64xf32, #tpu.memory_space<vmem>>, vector<64x64xf32>
    %cst_10 = arith.constant dense<0.000000e+00> : vector<64x128xf32>
    %59 = tpu.matmul %58, %57, %cst_10 {dimension_numbers = #tpu.dot_dimension_numbers<[1], [0], [0], [1], [0, 0, 1, 1], [], []>} : vector<64x64xf32>, vector<64x128xf32>, vector<64x128xf32> -> vector<64x128xf32>
    %60 = vector.extract_strided_slice %59 {offsets = [0, 0], sizes = [32, 128], strides = [1, 1]} : vector<64x128xf32> to vector<32x128xf32>
    %61 = vector.extract_strided_slice %59 {offsets = [32, 0], sizes = [32, 128], strides = [1, 1]} : vector<64x128xf32> to vector<32x128xf32>
    %62 = arith.mulf %60, %60 : vector<32x128xf32>
    %63 = arith.subf %62, %61 : vector<32x128xf32>
    %cst_11 = arith.constant dense<0.000000e+00> : vector<128xf32>
    %64 = vector.multi_reduction <add>, %63, %cst_11 [0] : vector<32x128xf32> to vector<128xf32>
    %65 = vector.shape_cast %64 : vector<128xf32> to vector<1x128xf32>
    %cst_12 = arith.constant 5.000000e-01 : f32
    %66 = vector.broadcast %cst_12 : f32 to vector<1x128xf32>
    %67 = arith.mulf %66, %65 : vector<1x128xf32>
    %c0_13 = arith.constant 0 : index
    %c0_14 = arith.constant 0 : index
    %68 = vector.load %arg3[%c0_13, %c0_14] : memref<1x128xf32, #tpu.memory_space<vmem>>, vector<1x128xf32>
    tpu.vector_store %arg3[%c0_13, %c0_14], %67 {strides = array<i32>} : memref<1x128xf32, #tpu.memory_space<vmem>>, vector<1x128xf32>,
    return
  }
  func.func @transform_0(%arg0: i32) -> (i32, i32) {
    %c0_i32 = arith.constant 0 : i32
    %c0_i32_0 = arith.constant 0 : i32
    return %c0_i32, %arg0 : i32, i32
  }
  func.func @transform_1(%arg0: i32) -> (i32, i32) {
    %c0_i32 = arith.constant 0 : i32
    %c0_i32_0 = arith.constant 0 : i32
    %c0_i32_1 = arith.constant 0 : i32
    return %c0_i32, %c0_i32_0 : i32, i32
  }
  func.func @transform_2(%arg0: i32) -> (i32, i32) {
    %c0_i32 = arith.constant 0 : i32
    %c0_i32_0 = arith.constant 0 : i32
    return %c0_i32, %arg0 : i32, i32
  }
}

module attributes {stable_mosaic.version = 11 : i64} {
  func.func @_masked_fm_kernel(%arg0: i32, %arg1: memref<8x128xi32, #tpu.memory_space<vmem>>, %arg2: memref<64x64xf32, #tpu.memory_space<vmem>>, %arg3: memref<1x128xf32, #tpu.memory_space<vmem>>) attributes {dimension_semantics = [#tpu.dimension_semantics<parallel>], iteration_bounds = array<i64: 1>, scalar_prefetch = 0 : i64, scratch_operands = 0 : i64, tpu.core_type = #tpu.core_type<tc>, window_params = [{transform_indices = @transform_0, window_bounds = array<i64: 8, 128>}, {pipeline_mode = #tpu.pipeline_mode<synchronous>, transform_indices = @transform_1, window_bounds = array<i64: 64, 64>}, {transform_indices = @transform_2, window_bounds = array<i64: 1, 128>}]} {
    %0 = tpu.iota {dimensions = array<i32: 0>} : vector<64x1xi32>
    %cst = arith.constant 0.000000e+00 : f32
    %1 = vector.broadcast %cst : f32 to vector<64x128xf32>
    %c0 = arith.constant 0 : index
    %c0_0 = arith.constant 0 : index
    %2 = vector.load %arg1[%c0, %c0_0] : memref<8x128xi32, #tpu.memory_space<vmem>>, vector<1x128xi32>
    %3 = vector.broadcast %0 : vector<64x1xi32> to vector<64x128xi32>
    %4 = vector.broadcast %2 : vector<1x128xi32> to vector<64x128xi32>
    %5 = arith.cmpi eq, %3, %4 : vector<64x128xi32>
    %6 = arith.extui %5 : vector<64x128xi1> to vector<64x128xi32>
    %7 = arith.sitofp %6 : vector<64x128xi32> to vector<64x128xf32>
    %8 = arith.addf %1, %7 : vector<64x128xf32>
    %c1 = arith.constant 1 : index
    %c0_1 = arith.constant 0 : index
    %9 = vector.load %arg1[%c1, %c0_1] : memref<8x128xi32, #tpu.memory_space<vmem>>, vector<1x128xi32>
    %10 = vector.broadcast %0 : vector<64x1xi32> to vector<64x128xi32>
    %11 = vector.broadcast %9 : vector<1x128xi32> to vector<64x128xi32>
    %12 = arith.cmpi eq, %10, %11 : vector<64x128xi32>
    %13 = arith.extui %12 : vector<64x128xi1> to vector<64x128xi32>
    %14 = arith.sitofp %13 : vector<64x128xi32> to vector<64x128xf32>
    %15 = arith.addf %8, %14 : vector<64x128xf32>
    %c2 = arith.constant 2 : index
    %c0_2 = arith.constant 0 : index
    %16 = vector.load %arg1[%c2, %c0_2] : memref<8x128xi32, #tpu.memory_space<vmem>>, vector<1x128xi32>
    %17 = vector.broadcast %0 : vector<64x1xi32> to vector<64x128xi32>
    %18 = vector.broadcast %16 : vector<1x128xi32> to vector<64x128xi32>
    %19 = arith.cmpi eq, %17, %18 : vector<64x128xi32>
    %20 = arith.extui %19 : vector<64x128xi1> to vector<64x128xi32>
    %21 = arith.sitofp %20 : vector<64x128xi32> to vector<64x128xf32>
    %22 = arith.addf %15, %21 : vector<64x128xf32>
    %c3 = arith.constant 3 : index
    %c0_3 = arith.constant 0 : index
    %23 = vector.load %arg1[%c3, %c0_3] : memref<8x128xi32, #tpu.memory_space<vmem>>, vector<1x128xi32>
    %24 = vector.broadcast %0 : vector<64x1xi32> to vector<64x128xi32>
    %25 = vector.broadcast %23 : vector<1x128xi32> to vector<64x128xi32>
    %26 = arith.cmpi eq, %24, %25 : vector<64x128xi32>
    %27 = arith.extui %26 : vector<64x128xi1> to vector<64x128xi32>
    %28 = arith.sitofp %27 : vector<64x128xi32> to vector<64x128xf32>
    %29 = arith.addf %22, %28 : vector<64x128xf32>
    %c4 = arith.constant 4 : index
    %c0_4 = arith.constant 0 : index
    %30 = vector.load %arg1[%c4, %c0_4] : memref<8x128xi32, #tpu.memory_space<vmem>>, vector<1x128xi32>
    %31 = vector.broadcast %0 : vector<64x1xi32> to vector<64x128xi32>
    %32 = vector.broadcast %30 : vector<1x128xi32> to vector<64x128xi32>
    %33 = arith.cmpi eq, %31, %32 : vector<64x128xi32>
    %34 = arith.extui %33 : vector<64x128xi1> to vector<64x128xi32>
    %35 = arith.sitofp %34 : vector<64x128xi32> to vector<64x128xf32>
    %36 = arith.addf %29, %35 : vector<64x128xf32>
    %c5 = arith.constant 5 : index
    %c0_5 = arith.constant 0 : index
    %37 = vector.load %arg1[%c5, %c0_5] : memref<8x128xi32, #tpu.memory_space<vmem>>, vector<1x128xi32>
    %38 = vector.broadcast %0 : vector<64x1xi32> to vector<64x128xi32>
    %39 = vector.broadcast %37 : vector<1x128xi32> to vector<64x128xi32>
    %40 = arith.cmpi eq, %38, %39 : vector<64x128xi32>
    %41 = arith.extui %40 : vector<64x128xi1> to vector<64x128xi32>
    %42 = arith.sitofp %41 : vector<64x128xi32> to vector<64x128xf32>
    %43 = arith.addf %36, %42 : vector<64x128xf32>
    %c6 = arith.constant 6 : index
    %c0_6 = arith.constant 0 : index
    %44 = vector.load %arg1[%c6, %c0_6] : memref<8x128xi32, #tpu.memory_space<vmem>>, vector<1x128xi32>
    %45 = vector.broadcast %0 : vector<64x1xi32> to vector<64x128xi32>
    %46 = vector.broadcast %44 : vector<1x128xi32> to vector<64x128xi32>
    %47 = arith.cmpi eq, %45, %46 : vector<64x128xi32>
    %48 = arith.extui %47 : vector<64x128xi1> to vector<64x128xi32>
    %49 = arith.sitofp %48 : vector<64x128xi32> to vector<64x128xf32>
    %50 = arith.addf %43, %49 : vector<64x128xf32>
    %c7 = arith.constant 7 : index
    %c0_7 = arith.constant 0 : index
    %51 = vector.load %arg1[%c7, %c0_7] : memref<8x128xi32, #tpu.memory_space<vmem>>, vector<1x128xi32>
    %52 = vector.broadcast %0 : vector<64x1xi32> to vector<64x128xi32>
    %53 = vector.broadcast %51 : vector<1x128xi32> to vector<64x128xi32>
    %54 = arith.cmpi eq, %52, %53 : vector<64x128xi32>
    %55 = arith.extui %54 : vector<64x128xi1> to vector<64x128xi32>
    %56 = arith.sitofp %55 : vector<64x128xi32> to vector<64x128xf32>
    %57 = arith.addf %50, %56 : vector<64x128xf32>
    %c0_8 = arith.constant 0 : index
    %c0_9 = arith.constant 0 : index
    %58 = vector.load %arg2[%c0_8, %c0_9] : memref<64x64xf32, #tpu.memory_space<vmem>>, vector<64x64xf32>
    %cst_10 = arith.constant dense<0.000000e+00> : vector<64x128xf32>
    %59 = tpu.matmul %58, %57, %cst_10 {dimension_numbers = #tpu.dot_dimension_numbers<[1], [0], [0], [1], [0, 0, 1, 1], [], []>} : vector<64x64xf32>, vector<64x128xf32>, vector<64x128xf32> -> vector<64x128xf32>
    %60 = vector.extract_strided_slice %59 {offsets = [0, 0], sizes = [32, 128], strides = [1, 1]} : vector<64x128xf32> to vector<32x128xf32>
    %61 = vector.extract_strided_slice %59 {offsets = [32, 0], sizes = [32, 128], strides = [1, 1]} : vector<64x128xf32> to vector<32x128xf32>
    %62 = arith.mulf %60, %60 : vector<32x128xf32>
    %63 = arith.subf %62, %61 : vector<32x128xf32>
    %cst_11 = arith.constant dense<0.000000e+00> : vector<128xf32>
    %64 = vector.multi_reduction <add>, %63, %cst_11 [0] : vector<32x128xf32> to vector<128xf32>
    %65 = vector.shape_cast %64 : vector<128xf32> to vector<1x128xf32>
    %cst_12 = arith.constant 5.000000e-01 : f32
    %66 = vector.broadcast %cst_12 : f32 to vector<1x128xf32>
    %67 = arith.mulf %66, %65 : vector<1x128xf32>
    %c0_13 = arith.constant 0 : index
    %c0_14 = arith.constant 0 : index
    %68 = vector.load %arg3[%c0_13, %c0_14] : memref<1x128xf32, #tpu.memory_space<vmem>>, vector<1x128xf32>
    tpu.vector_store %arg3[%c0_13, %c0_14], %67 {strides = array<i32>} : memref<1x128xf32, #tpu.memory_space<vmem>>, vector<1x128xf32>,
    return
  }
  func.func @transform_0(%arg0: i32) -> (i32, i32) {
    %c0_i32 = arith.constant 0 : i32
    %c0_i32_0 = arith.constant 0 : i32
    return %c0_i32, %arg0 : i32, i32
  }
  func.func @transform_1(%arg0: i32) -> (i32, i32) {
    %c0_i32 = arith.constant 0 : i32
    %c0_i32_0 = arith.constant 0 : i32
    %c0_i32_1 = arith.constant 0 : i32
    return %c0_i32, %c0_i32_0 : i32, i32
  }
  func.func @transform_2(%arg0: i32) -> (i32, i32) {
    %c0_i32 = arith.constant 0 : i32
    %c0_i32_0 = arith.constant 0 : i32
    return %c0_i32, %arg0 : i32, i32
  }
}

</mosaic_0001>

<bundles_post_ra>
// kernel: tpu_custom_call.1
= control target key start
LH: loop header
LB: loop body
LE: loop exit
PB: predicated region body
PF: predicated region fallthrough
CT: control target
= control target key end

     0   :  { %7 = vsyncpa [#allocation3], 0  ;;  %s914_s0 = inlined_call_operand.hbm [shape: s32[8,128], index: 0, kind: input, shape index: {}]   ;;  %s915_s1 = inlined_call_operand.hbm [shape: f32[64,64], index: 1, kind: input, shape index: {}]   ;;  %s916_s2 = inlined_call_operand.hbm [shape: f32[1,128], index: 2, kind: output, shape index: {}]  }
   0x1   :  { %8 = vsyncpa [#allocation6], 0 }
   0x2   :  { %9 = vsyncpa [#allocation4], 0  ;;  %s15_s11 = sshll.u32 %s914_s0, 4  ;;  %s622_s12 = smov [#allocation2]   ;;  %s16_s11 = int_to_ptr.hbm [resolvable:$true] %s15_s11 }
   0x3   :  { %s17_s13 = sshll.u32 %s622_s12, 4  ;;  %s25_s16 = sshll.u32 %s915_s1, 4  ;;  %s18_s13 = int_to_ptr.vmem [resolvable:$true] %s17_s13  ;;  %s26_s16 = int_to_ptr.hbm [resolvable:$true] %s25_s16 }
   0x4   :  { %20 = dma.hbm_to_vmem [thread:$0]  %s16_s11, 128, %s18_s13, [#allocation3]  }
   0x5   :  { %s623_s17 = smov [#allocation5]   ;;  %s624_s19 = smov 128  }
   0x6   :  { %s27_s18 = sshll.u32 %s623_s17, 4  ;;  %s625_s20 = smov 8   ;;  %s28_s18 = int_to_ptr.vmem [resolvable:$true] %s27_s18 }
   0x7   :  { %33 = dma.hbm_to_vmem [thread:$0]  %s26_s16, 1024, %s28_s18, [#allocation6], %s624_s19, %s624_s19, %s625_s20  }
   0x8   :  { %616 = dma.done.wait [#allocation3], 128  }
   0x9   :  { %617 = vsyncadd [#allocation3], 4294967168 }
   0xa   :  { %618 = dma.done.wait [#allocation6], 1024  }
   0xb   :  { %619 = vsyncadd [#allocation6], 4294966272  ;;  %v42_v0 = vlaneseq  ;;  %v667_v8 = vld [vmem:[#allocation2] ss:$0 sm:$0xff]  ;;  %v669_v9 = vld [vmem:[#allocation2 + $0x1] ss:$0 sm:$0xff] }
   0xc   :  { %v671_v10 = vld [vmem:[#allocation2 + $0x2] ss:$0 sm:$0xff]  ;;  %v674_v11 = vld [vmem:[#allocation2 + $0x3] ss:$0 sm:$0xff]  ;;  %v626_v12 = vmov 0.0   ;;  %s627_s0 = smov [#allocation7]  }
   0xd   :  { %v649_v1 = vshrl.u32 %v42_v0, 7  ;;  %v681_v14 = vld [vmem:[#allocation2 + $0x4] ss:$0 sm:$0xff]  ;;  %v687_v18 = vld [vmem:[#allocation2 + $0x5] ss:$0 sm:$0xff]  ;;  %s421_s1 = sshll.u32 %s627_s0, 4  ;;  %s422_s1 = int_to_ptr.vmem [resolvable:$true] %s421_s1 }
   0xe   :  { %v692_v20 = vld [vmem:[#allocation2 + $0x6] ss:$0 sm:$0xff]  ;;  %v699_v23 = vld [vmem:[#allocation2 + $0x7] ss:$0 sm:$0xff]  ;;  %s423_s23 = sshll.u32 %s916_s2, 4  ;;  %s424_s23 = int_to_ptr.hbm [resolvable:$true] %s423_s23 }
   0xf   :  { %v50_v2 = vadd.s32 56, %v649_v1  ;;  %v653_v3 = vadd.s32 48, %v649_v1  ;;  %v656_v4 = vadd.s32 40, %v649_v1  ;;  %v659_v5 = vadd.s32 32, %v649_v1 }
  0x10   :  { %v662_v6 = vadd.s32 24, %v649_v1  ;;  %v665_v7 = vadd.s32 16, %v649_v1  ;;  %v747_v51 = vadd.s32 8, %v649_v1 }
  0x11   :  { %vm60_vm0 = vcmp.eq.s32.totalorder %v50_v2, %v667_v8  ;;  %vm59_vm1 = vcmp.eq.s32.totalorder %v653_v3, %v667_v8  ;;  %vm94_vm2 = vcmp.eq.s32.totalorder %v50_v2, %v669_v9  ;;  %vm128_vm3 = vcmp.eq.s32.totalorder %v50_v2, %v671_v10 }
  0x12   :  { %v441_v13 = vsel %vm60_vm0, 1.0, %v626_v12  ;;  %v440_v15 = vsel %vm59_vm1, 1.0, %v626_v12  ;;  %v449_v16 = vsel %vm94_vm2, 1.0, %v626_v12  ;;  %v457_v17 = vsel %vm128_vm3, 1.0, %v626_v12 }
  0x13   :  { %vm162_vm4 = vcmp.eq.s32.totalorder %v50_v2, %v674_v11  ;;  %vm93_vm5 = vcmp.eq.s32.totalorder %v653_v3, %v669_v9  ;;  %v118_v19 = vadd.f32 %v449_v16, %v441_v13  ;;  %vm196_vm6 = vcmp.eq.s32.totalorder %v50_v2, %v681_v14 }
  0x14   :  { %v448_v21 = vsel %vm93_vm5, 1.0, %v626_v12  ;;  %vm58_vm7 = vcmp.eq.s32.totalorder %v656_v4, %v667_v8  ;;  %v465_v22 = vsel %vm162_vm4, 1.0, %v626_v12  ;;  %vm230_vm8 = vcmp.eq.s32.totalorder %v50_v2, %v687_v18 }
  0x15   :  { %v117_v24 = vadd.f32 %v448_v21, %v440_v15  ;;  %vm127_vm9 = vcmp.eq.s32.totalorder %v653_v3, %v671_v10  ;;  %vm57_vm10 = vcmp.eq.s32.totalorder %v659_v5, %v667_v8  ;;  %v152_v25 = vadd.f32 %v457_v17, %v118_v19 }
  0x16   :  { %v473_v26 = vsel %vm196_vm6, 1.0, %v626_v12  ;;  %vm264_vm11 = vcmp.eq.s32.totalorder %v50_v2, %v692_v20  ;;  %v456_v27 = vsel %vm127_vm9, 1.0, %v626_v12  ;;  %v481_v28 = vsel %vm230_vm8, 1.0, %v626_v12 }
  0x17   :  { %vm298_vm12 = vcmp.eq.s32.totalorder %v50_v2, %v699_v23  ;;  %v151_v29 = vadd.f32 %v456_v27, %v117_v24  ;;  %vm161_vm13 = vcmp.eq.s32.totalorder %v653_v3, %v674_v11  ;;  %v186_v30 = vadd.f32 %v465_v22, %v152_v25 }
  0x18   :  { %v489_v31 = vsel %vm264_vm11, 1.0, %v626_v12  ;;  %v464_v32 = vsel %vm161_vm13, 1.0, %v626_v12  ;;  %vm195_vm14 = vcmp.eq.s32.totalorder %v653_v3, %v681_v14  ;;  %vm229_vm15 = vcmp.eq.s32.totalorder %v653_v3, %v687_v18 }
  0x19   :  { %v185_v33 = vadd.f32 %v464_v32, %v151_v29  ;;  %v472_v34 = vsel %vm195_vm14, 1.0, %v626_v12  ;;  %vm263_vm0 = vcmp.eq.s32.totalorder %v653_v3, %v692_v20  ;;  %v220_v35 = vadd.f32 %v473_v26, %v186_v30 }
  0x1a   :  { %v497_v36 = vsel %vm298_vm12, 1.0, %v626_v12  ;;  %v480_v37 = vsel %vm229_vm15, 1.0, %v626_v12  ;;  %vm297_vm1 = vcmp.eq.s32.totalorder %v653_v3, %v699_v23  ;;  %v488_v39 = vsel %vm263_vm0, 1.0, %v626_v12 }
  0x1b   :  { %v219_v38 = vadd.f32 %v472_v34, %v185_v33  ;;  %v439_v40 = vsel %vm58_vm7, 1.0, %v626_v12  ;;  %vm92_vm2 = vcmp.eq.s32.totalorder %v656_v4, %v669_v9  ;;  %v254_v41 = vadd.f32 %v481_v28, %v220_v35 }
  0x1c   :  { %v447_v42 = vsel %vm92_vm2, 1.0, %v626_v12  ;;  %vm126_vm3 = vcmp.eq.s32.totalorder %v656_v4, %v671_v10  ;;  %vm160_vm4 = vcmp.eq.s32.totalorder %v656_v4, %v674_v11  ;;  %v496_v44 = vsel %vm297_vm1, 1.0, %v626_v12 }
  0x1d   :  { %v253_v43 = vadd.f32 %v480_v37, %v219_v38  ;;  %v116_v45 = vadd.f32 %v447_v42, %v439_v40  ;;  %v455_v46 = vsel %vm126_vm3, 1.0, %v626_v12  ;;  %v288_v47 = vadd.f32 %v489_v31, %v254_v41 }
  0x1e   :  { %v463_v48 = vsel %vm160_vm4, 1.0, %v626_v12  ;;  %vm194_vm5 = vcmp.eq.s32.totalorder %v656_v4, %v681_v14  ;;  %vm228_vm6 = vcmp.eq.s32.totalorder %v656_v4, %v687_v18  ;;  %vm262_vm7 = vcmp.eq.s32.totalorder %v656_v4, %v692_v20 }
  0x1f   :  { %v287_v49 = vadd.f32 %v488_v39, %v253_v43  ;;  %v150_v50 = vadd.f32 %v455_v46, %v116_v45  ;;  %v322_v52 = vadd.f32 %v497_v36, %v288_v47  ;;  %v471_v53 = vsel %vm194_vm5, 1.0, %v626_v12 }
  0x20   :  { %v479_v54 = vsel %vm228_vm6, 1.0, %v626_v12  ;;  %v438_v55 = vsel %vm57_vm10, 1.0, %v626_v12  ;;  %vm296_vm8 = vcmp.eq.s32.totalorder %v656_v4, %v699_v23  ;;  %vm91_vm9 = vcmp.eq.s32.totalorder %v659_v5, %v669_v9 }
  0x21   :  { %v321_v56 = vadd.f32 %v496_v44, %v287_v49  ;;  %v184_v57 = vadd.f32 %v463_v48, %v150_v50  ;;  %507 = vmatpush.msra.mxu2 %v322_v52  ;;  %364 = vmatpush.msra.mxu0 %v322_v52  ;;  %v446_v58 = vsel %vm91_vm9, 1.0, %v626_v12  ;;  %vm125_vm11 = vcmp.eq.s32.totalorder %v659_v5, %v671_v10 }
  0x22   :  { %vm159_vm12 = vcmp.eq.s32.totalorder %v659_v5, %v674_v11  ;;  %vm193_vm10 = vcmp.eq.s32.totalorder %v659_v5, %v681_v14  ;;  %508 = vmatpush.msra.mxu3 %v322_v52  ;;  %v487_v60 = vsel %vm262_vm7, 1.0, %v626_v12  ;;  %v115_v61 = vadd.f32 %v446_v58, %v438_v55  ;;  %506 = vmatpush.msra.mxu1 %v322_v52 }
  0x23   :  { %v218_v59 = vadd.f32 %v471_v53, %v184_v57  ;;  %v454_v62 = vsel %vm125_vm11, 1.0, %v626_v12  ;;  %510 = vmatpush.msra.mxu2 %v321_v56  ;;  %v495_v63 = vsel %vm296_vm8, 1.0, %v626_v12  ;;  %365 = vmatpush.msra.mxu0 %v321_v56  ;;  %v462_v0 = vsel %vm159_vm12, 1.0, %v626_v12 }
  0x24   :  { %vm227_vm13 = vcmp.eq.s32.totalorder %v659_v5, %v687_v18  ;;  %vm261_vm14 = vcmp.eq.s32.totalorder %v659_v5, %v692_v20  ;;  %511 = vmatpush.msra.mxu3 %v321_v56  ;;  %v149_v3 = vadd.f32 %v454_v62, %v115_v61  ;;  %v470_v4 = vsel %vm193_vm10, 1.0, %v626_v12  ;;  %509 = vmatpush.msra.mxu1 %v321_v56 }
  0x25   :  { %v252_v2 = vadd.f32 %v479_v54, %v218_v59  ;;  %vm295_vm15 = vcmp.eq.s32.totalorder %v659_v5, %v699_v23  ;;  %v478_v13 = vsel %vm227_vm13, 1.0, %v626_v12  ;;  %vm56_vm0 = vcmp.eq.s32.totalorder %v662_v6, %v667_v8 }
  0x26   :  { %vm90_vm1 = vcmp.eq.s32.totalorder %v662_v6, %v669_v9  ;;  %vm124_vm2 = vcmp.eq.s32.totalorder %v662_v6, %v671_v10  ;;  %v183_v16 = vadd.f32 %v462_v0, %v149_v3  ;;  %v437_v17 = vsel %vm56_vm0, 1.0, %v626_v12 }
  0x27   :  { %v286_v15 = vadd.f32 %v487_v60, %v252_v2  ;;  %v445_v19 = vsel %vm90_vm1, 1.0, %v626_v12  ;;  %v453_v22 = vsel %vm124_vm2, 1.0, %v626_v12  ;;  %vm158_vm3 = vcmp.eq.s32.totalorder %v662_v6, %v674_v11 }
  0x28   :  { %v114_v21 = vadd.f32 %v445_v19, %v437_v17  ;;  %vm192_vm4 = vcmp.eq.s32.totalorder %v662_v6, %v681_v14  ;;  %v217_v25 = vadd.f32 %v470_v4, %v183_v16  ;;  %v486_v26 = vsel %vm261_vm14, 1.0, %v626_v12 }
  0x29   :  { %v320_v24 = vadd.f32 %v495_v63, %v286_v15  ;;  %v461_v27 = vsel %vm158_vm3, 1.0, %v626_v12  ;;  %v494_v28 = vsel %vm295_vm15, 1.0, %v626_v12  ;;  %v469_v30 = vsel %vm192_vm4, 1.0, %v626_v12 }
  0x2a   :  { %v148_v29 = vadd.f32 %v453_v22, %v114_v21  ;;  %vm226_vm5 = vcmp.eq.s32.totalorder %v662_v6, %v687_v18  ;;  %v251_v31 = vadd.f32 %v478_v13, %v217_v25  ;;  %vm260_vm6 = vcmp.eq.s32.totalorder %v662_v6, %v692_v20 }
  0x2b   :  { %513 = vmatpush.msra.mxu2 %v320_v24  ;;  %366 = vmatpush.msra.mxu0 %v320_v24  ;;  %v477_v32 = vsel %vm226_vm5, 1.0, %v626_v12  ;;  %vm294_vm7 = vcmp.eq.s32.totalorder %v662_v6, %v699_v23  ;;  %vm55_vm8 = vcmp.eq.s32.totalorder %v665_v7, %v667_v8  ;;  %vm89_vm9 = vcmp.eq.s32.totalorder %v665_v7, %v669_v9 }
  0x2c   :  { %514 = vmatpush.msra.mxu3 %v320_v24  ;;  %v182_v5 = vadd.f32 %v461_v27, %v148_v29  ;;  %vm123_vm11 = vcmp.eq.s32.totalorder %v665_v7, %v671_v10  ;;  %v285_v33 = vadd.f32 %v486_v26, %v251_v31  ;;  %v436_v34 = vsel %vm55_vm8, 1.0, %v626_v12  ;;  %512 = vmatpush.msra.mxu1 %v320_v24  ;;  %v327_v27 = vld [vmem:[#allocation5 + $0x20] sm:$0xff]  ;;  %v330_v29 = vld [vmem:[#allocation5 + $0x38] sm:$0xff] }
  0x2d   :  { %v444_v35 = vsel %vm89_vm9, 1.0, %v626_v12  ;;  %v452_v36 = vsel %vm123_vm11, 1.0, %v626_v12  ;;  %vm157_vm12 = vcmp.eq.s32.totalorder %v665_v7, %v674_v11  ;;  %vm191_vm10 = vcmp.eq.s32.totalorder %v665_v7, %v681_v14 }
  0x2e   :  { %v216_v37 = vadd.f32 %v469_v30, %v182_v5  ;;  %v113_v38 = vadd.f32 %v444_v35, %v436_v34  ;;  %v319_v39 = vadd.f32 %v494_v28, %v285_v33  ;;  %v485_v40 = vsel %vm260_vm6, 1.0, %v626_v12  ;;  %v329_v28 = vld [vmem:[#allocation5 + $0x30] sm:$0xff]  ;;  %v326_v30 = vld [vmem:[#allocation5 + $0x18] sm:$0xff] }
  0x2f   :  { %v460_v41 = vsel %vm157_vm12, 1.0, %v626_v12  ;;  %vm225_vm13 = vcmp.eq.s32.totalorder %v665_v7, %v687_v18  ;;  %v493_v43 = vsel %vm294_vm7, 1.0, %v626_v12  ;;  %v468_v45 = vsel %vm191_vm10, 1.0, %v626_v12 }
  0x30   :  { %v250_v42 = vadd.f32 %v477_v32, %v216_v37  ;;  %v147_v44 = vadd.f32 %v452_v36, %v113_v38  ;;  %516 = vmatpush.msra.mxu2 %v319_v39  ;;  %367 = vmatpush.msra.mxu0 %v319_v39  ;;  %v476_v46 = vsel %vm225_vm13, 1.0, %v626_v12  ;;  %vm259_vm14 = vcmp.eq.s32.totalorder %v665_v7, %v692_v20 }
  0x31   :  { %vm54_vm15 = vcmp.eq.s32.totalorder %v747_v51, %v667_v8  ;;  %vm88_vm0 = vcmp.eq.s32.totalorder %v747_v51, %v669_v9  ;;  %517 = vmatpush.msra.mxu3 %v319_v39  ;;  %vm293_vm1 = vcmp.eq.s32.totalorder %v665_v7, %v699_v23  ;;  %515 = vmatpush.msra.mxu1 %v319_v39  ;;  %v484_v55 = vsel %vm259_vm14, 1.0, %v626_v12 }
  0x32   :  { %v284_v47 = vadd.f32 %v485_v40, %v250_v42  ;;  %v181_v6 = vadd.f32 %v460_v41, %v147_v44  ;;  %v435_v48 = vsel %vm54_vm15, 1.0, %v626_v12  ;;  %v443_v49 = vsel %vm88_vm0, 1.0, %v626_v12 }
  0x33   :  { %vm122_vm2 = vcmp.eq.s32.totalorder %v747_v51, %v671_v10  ;;  %vm156_vm3 = vcmp.eq.s32.totalorder %v747_v51, %v674_v11  ;;  %vm190_vm4 = vcmp.eq.s32.totalorder %v747_v51, %v681_v14  ;;  %v112_v53 = vadd.f32 %v443_v49, %v435_v48 }
  0x34   :  { %v318_v50 = vadd.f32 %v493_v43, %v284_v47  ;;  %v215_v52 = vadd.f32 %v468_v45, %v181_v6  ;;  %v451_v54 = vsel %vm122_vm2, 1.0, %v626_v12  ;;  %v459_v56 = vsel %vm156_vm3, 1.0, %v626_v12 }
  0x35   :  { %vm224_vm5 = vcmp.eq.s32.totalorder %v747_v51, %v687_v18  ;;  %v492_v58 = vsel %vm293_vm1, 1.0, %v626_v12  ;;  %v146_v59 = vadd.f32 %v451_v54, %v112_v53  ;;  %v467_v60 = vsel %vm190_vm4, 1.0, %v626_v12 }
  0x36   :  { %519 = vmatpush.msra.mxu2 %v318_v50  ;;  %v249_v57 = vadd.f32 %v476_v46, %v215_v52  ;;  %368 = vmatpush.msra.mxu0 %v318_v50  ;;  %vm258_vm6 = vcmp.eq.s32.totalorder %v747_v51, %v692_v20  ;;  %vm53_vm7 = vcmp.eq.s32.totalorder %v649_v1, %v667_v8  ;;  %v475_v62 = vsel %vm224_vm5, 1.0, %v626_v12 }
  0x37   :  { %520 = vmatpush.msra.mxu3 %v318_v50  ;;  %vm87_vm8 = vcmp.eq.s32.totalorder %v649_v1, %v669_v9  ;;  %vm121_vm9 = vcmp.eq.s32.totalorder %v649_v1, %v671_v10  ;;  %v180_v7 = vadd.f32 %v459_v56, %v146_v59  ;;  %v434_v63 = vsel %vm53_vm7, 1.0, %v626_v12  ;;  %518 = vmatpush.msra.mxu1 %v318_v50 }
  0x38   :  { %v283_v61 = vadd.f32 %v484_v55, %v249_v57  ;;  %vm292_vm11 = vcmp.eq.s32.totalorder %v747_v51, %v699_v23  ;;  %v442_v0 = vsel %vm87_vm8, 1.0, %v626_v12  ;;  %v450_v8 = vsel %vm121_vm9, 1.0, %v626_v12 }
  0x39   :  { %vm155_vm12 = vcmp.eq.s32.totalorder %v649_v1, %v674_v11  ;;  %v214_v2 = vadd.f32 %v467_v60, %v180_v7  ;;  %v111_v10 = vadd.f32 %v442_v0, %v434_v63  ;;  %vm189_vm10 = vcmp.eq.s32.totalorder %v649_v1, %v681_v14 }
  0x3a   :  { %v317_v9 = vadd.f32 %v492_v58, %v283_v61  ;;  %v483_v3 = vsel %vm258_vm6, 1.0, %v626_v12  ;;  %v458_v4 = vsel %vm155_vm12, 1.0, %v626_v12  ;;  %vm223_vm13 = vcmp.eq.s32.totalorder %v649_v1, %v687_v18 }
  0x3b   :  { %v248_v13 = vadd.f32 %v475_v62, %v214_v2  ;;  %v145_v15 = vadd.f32 %v450_v8, %v111_v10  ;;  %v491_v11 = vsel %vm292_vm11, 1.0, %v626_v12  ;;  %v466_v16 = vsel %vm189_vm10, 1.0, %v626_v12 }
  0x3c   :  { %522 = vmatpush.msra.mxu2 %v317_v9  ;;  %369 = vmatpush.msra.mxu0 %v317_v9  ;;  %vm257_vm14 = vcmp.eq.s32.totalorder %v649_v1, %v692_v20  ;;  %v474_v51 = vsel %vm223_vm13, 1.0, %v626_v12  ;;  %vm291_vm15 = vcmp.eq.s32.totalorder %v649_v1, %v699_v23  ;;  %vm331_vm0 = vcmask 523264   ;;  %v323_v20 = vld [vmem:[#allocation5] sm:$0xff]  ;;  %v325_v1 = vld [vmem:[#allocation5 + $0x10] sm:$0xff]  ;;  %v324_v23 = vld [vmem:[#allocation5 + $0x8] sm:$0xff] }
  0x3d   :  { %523 = vmatpush.msra.mxu3 %v317_v9  ;;  %521 = vmatpush.msra.mxu1 %v317_v9  ;;  %v282_v14 = vadd.f32 %v483_v3, %v248_v13  ;;  %v179_v17 = vadd.f32 %v458_v4, %v145_v15  ;;  %v482_v18 = vsel %vm257_vm14, 1.0, %v626_v12  ;;  %v490_v24 = vsel %vm291_vm15, 1.0, %v626_v12  ;;  %v328_v12 = vld [vmem:[#allocation5 + $0x28] sm:$0xff] }
  0x3f   :  { %v316_v19 = vadd.f32 %v491_v11, %v282_v14  ;;  %v213_v21 = vadd.f32 %v466_v16, %v179_v17 }
  0x41   :  { %525 = vmatpush.msra.mxu2 %v316_v19  ;;  %v247_v22 = vadd.f32 %v474_v51, %v213_v21  ;;  %370 = vmatpush.msra.mxu0 %v316_v19 }
  0x42   :  { %526 = vmatpush.msra.mxu3 %v316_v19  ;;  %524 = vmatpush.msra.mxu1 %v316_v19 }
  0x43   :  { %v281_v25 = vadd.f32 %v482_v18, %v247_v22 }
  0x45   :  { %v315_v26 = vadd.f32 %v490_v24, %v281_v25 }
  0x47   :  { %528 = vmatpush.msra.mxu2 %v315_v26  ;;  %371 = vmatpush.msra.mxu0 %v315_v26 }
  0x48   :  { %502 = vmatmul.msk.f32.vlgmr.msra.gmra.mxu2 %vm331_vm0, %v327_v27  ;;  %529 = vmatpush.msra.mxu3 %v315_v26 }
  0x49   :  { %498 = vmatmul.msk.f32.vlgmr.msra.gmra.mxu0 %vm331_vm0, %v323_v20  ;;  %504 = vmatmul.msk.f32.vlgmr.msra.gmra.mxu3 %vm331_vm0, %v329_v28 }
  0x4a   :  { %527 = vmatpush.msra.mxu1 %v315_v26 }
  0x4b   :  { %500 = vmatmul.msk.f32.vlgmr.msra.gmra.mxu1 %vm331_vm0, %v325_v1 }
  0x50   :  { %503 = vmatmul.msk.f32.gmra.mxu2 %vm331_vm0, %v328_v12 }
  0x51   :  { %499 = vmatmul.msk.f32.gmra.mxu0 %vm331_vm0, %v324_v23  ;;  %505 = vmatmul.msk.f32.gmra.mxu3 %vm331_vm0, %v330_v29 }
  0x53   :  { %501 = vmatmul.msk.f32.gmra.mxu1 %vm331_vm0, %v326_v30 }
  0xc6   :  { %v373_v31 = vpop.f32.mrf.mxu0 }
  0xc7   :  { %v397_v35 = vmul.f32 %v373_v31, %v373_v31 }
  0xc8   :  { %v379_v32 = vpop.f32.mrf.mxu1 }
  0xc9   :  { %v399_v38 = vmul.f32 %v379_v32, %v379_v32 }
  0xcb   :  { %v385_v5 = vpop.f32.mrf.mxu2 }
  0xcc   :  { %v391_v33 = vpop.f32.mrf.mxu3  ;;  %v401_v41 = vsub.f32 %v397_v35, %v385_v5 }
  0xcd   :  { %v403_v44 = vsub.f32 %v399_v38, %v391_v33 }
  0xce   :  { %v376_v34 = vpop.f32.mrf.mxu0 }
  0xcf   :  { %v398_v36 = vmul.f32 %v376_v34, %v376_v34 }
  0xd0   :  { %v382_v37 = vpop.f32.mrf.mxu1 }
  0xd1   :  { %v400_v39 = vmul.f32 %v382_v37, %v382_v37 }
  0xd3   :  { %v388_v40 = vpop.f32.mrf.mxu2 }
  0xd4   :  { %v402_v42 = vsub.f32 %v398_v36, %v388_v40  ;;  %v394_v43 = vpop.f32.mrf.mxu3 }
  0xd5   :  { %v404_v46 = vsub.f32 %v400_v39, %v394_v43 }
  0xd6   :  { %v405_v45 = vadd.f32 %v402_v42, %v401_v41 }
  0xd8   :  { %v406_v47 = vadd.f32 %v405_v45, %v403_v44 }
  0xda   :  { %v407_v6 = vadd.f32 %v406_v47, %v404_v46 }
  0xdc   :  { %v408_v48 = vrot.slane %v407_v6, 4 }
  0xde   :  { %v409_v49 = vadd.f32 %v408_v48, %v407_v6 }
  0xe0   :  { %v410_v50 = vrot.slane %v409_v49, 2 }
  0xe2   :  { %v411_v52 = vadd.f32 %v410_v50, %v409_v49 }
  0xe4   :  { %v412_v53 = vrot.slane %v411_v52, 1 }
  0xe6   :  { %v413_v54 = vadd.f32 %v412_v53, %v411_v52 }
  0xe8   :  { %v414_v55 = vmul.f32 0.5, %v413_v54 }
  0xea   :  { %415 = vst [vmem:[#allocation7] sm:$0x1] %v414_v55 }
  0xeb   :  { %426 = dma.vmem_to_hbm [thread:$0]  %s422_s1, 16, %s424_s23, [#allocation4]  }
  0xec   :  { %620 = dma.done.wait [#allocation4], 16  }
  0xed   :  { %621 = vsyncadd [#allocation4], 4294967280 }
  0xee   :  { %431 = vsyncpa [#allocation3], 1 }
  0xef   :  { %432 = vsyncpa [#allocation6], 1 }
  0xf0   :  { %433 = vsyncpa [#allocation4], 1 }

// kernel: tpu_custom_call.1
= control target key start
LH: loop header
LB: loop body
LE: loop exit
PB: predicated region body
PF: predicated region fallthrough
CT: control target
= control target key end

     0   :  { %7 = vsyncpa [#allocation3], 0  ;;  %s914_s0 = inlined_call_operand.hbm [shape: s32[8,128], index: 0, kind: input, shape index: {}]   ;;  %s915_s1 = inlined_call_operand.hbm [shape: f32[64,64], index: 1, kind: input, shape index: {}]   ;;  %s916_s2 = inlined_call_operand.hbm [shape: f32[1,128], index: 2, kind: output, shape index: {}]  }
   0x1   :  { %8 = vsyncpa [#allocation6], 0 }
   0x2   :  { %9 = vsyncpa [#allocation4], 0  ;;  %s15_s11 = sshll.u32 %s914_s0, 4  ;;  %s622_s12 = smov [#allocation2]   ;;  %s16_s11 = int_to_ptr.hbm [resolvable:$true] %s15_s11 }
   0x3   :  { %s17_s13 = sshll.u32 %s622_s12, 4  ;;  %s25_s16 = sshll.u32 %s915_s1, 4  ;;  %s18_s13 = int_to_ptr.vmem [resolvable:$true] %s17_s13  ;;  %s26_s16 = int_to_ptr.hbm [resolvable:$true] %s25_s16 }
   0x4   :  { %20 = dma.hbm_to_vmem [thread:$0]  %s16_s11, 128, %s18_s13, [#allocation3]  }
   0x5   :  { %s623_s17 = smov [#allocation5]   ;;  %s624_s19 = smov 128  }
   0x6   :  { %s27_s18 = sshll.u32 %s623_s17, 4  ;;  %s625_s20 = smov 8   ;;  %s28_s18 = int_to_ptr.vmem [resolvable:$true] %s27_s18 }
   0x7   :  { %33 = dma.hbm_to_vmem [thread:$0]  %s26_s16, 1024, %s28_s18, [#allocation6], %s624_s19, %s624_s19, %s625_s20  }
   0x8   :  { %616 = dma.done.wait [#allocation3], 128  }
   0x9   :  { %617 = vsyncadd [#allocation3], 4294967168 }
   0xa   :  { %618 = dma.done.wait [#allocation6], 1024  }
   0xb   :  { %619 = vsyncadd [#allocation6], 4294966272  ;;  %v42_v0 = vlaneseq  ;;  %v667_v8 = vld [vmem:[#allocation2] ss:$0 sm:$0xff]  ;;  %v669_v9 = vld [vmem:[#allocation2 + $0x1] ss:$0 sm:$0xff] }
   0xc   :  { %v671_v10 = vld [vmem:[#allocation2 + $0x2] ss:$0 sm:$0xff]  ;;  %v674_v11 = vld [vmem:[#allocation2 + $0x3] ss:$0 sm:$0xff]  ;;  %v626_v12 = vmov 0.0   ;;  %s627_s0 = smov [#allocation7]  }
   0xd   :  { %v649_v1 = vshrl.u32 %v42_v0, 7  ;;  %v681_v14 = vld [vmem:[#allocation2 + $0x4] ss:$0 sm:$0xff]  ;;  %v687_v18 = vld [vmem:[#allocation2 + $0x5] ss:$0 sm:$0xff]  ;;  %s421_s1 = sshll.u32 %s627_s0, 4  ;;  %s422_s1 = int_to_ptr.vmem [resolvable:$true] %s421_s1 }
   0xe   :  { %v692_v20 = vld [vmem:[#allocation2 + $0x6] ss:$0 sm:$0xff]  ;;  %v699_v23 = vld [vmem:[#allocation2 + $0x7] ss:$0 sm:$0xff]  ;;  %s423_s23 = sshll.u32 %s916_s2, 4  ;;  %s424_s23 = int_to_ptr.hbm [resolvable:$true] %s423_s23 }
   0xf   :  { %v50_v2 = vadd.s32 56, %v649_v1  ;;  %v653_v3 = vadd.s32 48, %v649_v1  ;;  %v656_v4 = vadd.s32 40, %v649_v1  ;;  %v659_v5 = vadd.s32 32, %v649_v1 }
  0x10   :  { %v662_v6 = vadd.s32 24, %v649_v1  ;;  %v665_v7 = vadd.s32 16, %v649_v1  ;;  %v747_v51 = vadd.s32 8, %v649_v1 }
  0x11   :  { %vm60_vm0 = vcmp.eq.s32.totalorder %v50_v2, %v667_v8  ;;  %vm59_vm1 = vcmp.eq.s32.totalorder %v653_v3, %v667_v8  ;;  %vm94_vm2 = vcmp.eq.s32.totalorder %v50_v2, %v669_v9  ;;  %vm128_vm3 = vcmp.eq.s32.totalorder %v50_v2, %v671_v10 }
  0x12   :  { %v441_v13 = vsel %vm60_vm0, 1.0, %v626_v12  ;;  %v440_v15 = vsel %vm59_vm1, 1.0, %v626_v12  ;;  %v449_v16 = vsel %vm94_vm2, 1.0, %v626_v12  ;;  %v457_v17 = vsel %vm128_vm3, 1.0, %v626_v12 }
  0x13   :  { %vm162_vm4 = vcmp.eq.s32.totalorder %v50_v2, %v674_v11  ;;  %vm93_vm5 = vcmp.eq.s32.totalorder %v653_v3, %v669_v9  ;;  %v118_v19 = vadd.f32 %v449_v16, %v441_v13  ;;  %vm196_vm6 = vcmp.eq.s32.totalorder %v50_v2, %v681_v14 }
  0x14   :  { %v448_v21 = vsel %vm93_vm5, 1.0, %v626_v12  ;;  %vm58_vm7 = vcmp.eq.s32.totalorder %v656_v4, %v667_v8  ;;  %v465_v22 = vsel %vm162_vm4, 1.0, %v626_v12  ;;  %vm230_vm8 = vcmp.eq.s32.totalorder %v50_v2, %v687_v18 }
  0x15   :  { %v117_v24 = vadd.f32 %v448_v21, %v440_v15  ;;  %vm127_vm9 = vcmp.eq.s32.totalorder %v653_v3, %v671_v10  ;;  %vm57_vm10 = vcmp.eq.s32.totalorder %v659_v5, %v667_v8  ;;  %v152_v25 = vadd.f32 %v457_v17, %v118_v19 }
  0x16   :  { %v473_v26 = vsel %vm196_vm6, 1.0, %v626_v12  ;;  %vm264_vm11 = vcmp.eq.s32.totalorder %v50_v2, %v692_v20  ;;  %v456_v27 = vsel %vm127_vm9, 1.0, %v626_v12  ;;  %v481_v28 = vsel %vm230_vm8, 1.0, %v626_v12 }
  0x17   :  { %vm298_vm12 = vcmp.eq.s32.totalorder %v50_v2, %v699_v23  ;;  %v151_v29 = vadd.f32 %v456_v27, %v117_v24  ;;  %vm161_vm13 = vcmp.eq.s32.totalorder %v653_v3, %v674_v11  ;;  %v186_v30 = vadd.f32 %v465_v22, %v152_v25 }
  0x18   :  { %v489_v31 = vsel %vm264_vm11, 1.0, %v626_v12  ;;  %v464_v32 = vsel %vm161_vm13, 1.0, %v626_v12  ;;  %vm195_vm14 = vcmp.eq.s32.totalorder %v653_v3, %v681_v14  ;;  %vm229_vm15 = vcmp.eq.s32.totalorder %v653_v3, %v687_v18 }
  0x19   :  { %v185_v33 = vadd.f32 %v464_v32, %v151_v29  ;;  %v472_v34 = vsel %vm195_vm14, 1.0, %v626_v12  ;;  %vm263_vm0 = vcmp.eq.s32.totalorder %v653_v3, %v692_v20  ;;  %v220_v35 = vadd.f32 %v473_v26, %v186_v30 }
  0x1a   :  { %v497_v36 = vsel %vm298_vm12, 1.0, %v626_v12  ;;  %v480_v37 = vsel %vm229_vm15, 1.0, %v626_v12  ;;  %vm297_vm1 = vcmp.eq.s32.totalorder %v653_v3, %v699_v23  ;;  %v488_v39 = vsel %vm263_vm0, 1.0, %v626_v12 }
  0x1b   :  { %v219_v38 = vadd.f32 %v472_v34, %v185_v33  ;;  %v439_v40 = vsel %vm58_vm7, 1.0, %v626_v12  ;;  %vm92_vm2 = vcmp.eq.s32.totalorder %v656_v4, %v669_v9  ;;  %v254_v41 = vadd.f32 %v481_v28, %v220_v35 }
  0x1c   :  { %v447_v42 = vsel %vm92_vm2, 1.0, %v626_v12  ;;  %vm126_vm3 = vcmp.eq.s32.totalorder %v656_v4, %v671_v10  ;;  %vm160_vm4 = vcmp.eq.s32.totalorder %v656_v4, %v674_v11  ;;  %v496_v44 = vsel %vm297_vm1, 1.0, %v626_v12 }
  0x1d   :  { %v253_v43 = vadd.f32 %v480_v37, %v219_v38  ;;  %v116_v45 = vadd.f32 %v447_v42, %v439_v40  ;;  %v455_v46 = vsel %vm126_vm3, 1.0, %v626_v12  ;;  %v288_v47 = vadd.f32 %v489_v31, %v254_v41 }
  0x1e   :  { %v463_v48 = vsel %vm160_vm4, 1.0, %v626_v12  ;;  %vm194_vm5 = vcmp.eq.s32.totalorder %v656_v4, %v681_v14  ;;  %vm228_vm6 = vcmp.eq.s32.totalorder %v656_v4, %v687_v18  ;;  %vm262_vm7 = vcmp.eq.s32.totalorder %v656_v4, %v692_v20 }
  0x1f   :  { %v287_v49 = vadd.f32 %v488_v39, %v253_v43  ;;  %v150_v50 = vadd.f32 %v455_v46, %v116_v45  ;;  %v322_v52 = vadd.f32 %v497_v36, %v288_v47  ;;  %v471_v53 = vsel %vm194_vm5, 1.0, %v626_v12 }
  0x20   :  { %v479_v54 = vsel %vm228_vm6, 1.0, %v626_v12  ;;  %v438_v55 = vsel %vm57_vm10, 1.0, %v626_v12  ;;  %vm296_vm8 = vcmp.eq.s32.totalorder %v656_v4, %v699_v23  ;;  %vm91_vm9 = vcmp.eq.s32.totalorder %v659_v5, %v669_v9 }
  0x21   :  { %v321_v56 = vadd.f32 %v496_v44, %v287_v49  ;;  %v184_v57 = vadd.f32 %v463_v48, %v150_v50  ;;  %507 = vmatpush.msra.mxu2 %v322_v52  ;;  %364 = vmatpush.msra.mxu0 %v322_v52  ;;  %v446_v58 = vsel %vm91_vm9, 1.0, %v626_v12  ;;  %vm125_vm11 = vcmp.eq.s32.totalorder %v659_v5, %v671_v10 }
  0x22   :  { %vm159_vm12 = vcmp.eq.s32.totalorder %v659_v5, %v674_v11  ;;  %vm193_vm10 = vcmp.eq.s32.totalorder %v659_v5, %v681_v14  ;;  %508 = vmatpush.msra.mxu3 %v322_v52  ;;  %v487_v60 = vsel %vm262_vm7, 1.0, %v626_v12  ;;  %v115_v61 = vadd.f32 %v446_v58, %v438_v55  ;;  %506 = vmatpush.msra.mxu1 %v322_v52 }
  0x23   :  { %v218_v59 = vadd.f32 %v471_v53, %v184_v57  ;;  %v454_v62 = vsel %vm125_vm11, 1.0, %v626_v12  ;;  %510 = vmatpush.msra.mxu2 %v321_v56  ;;  %v495_v63 = vsel %vm296_vm8, 1.0, %v626_v12  ;;  %365 = vmatpush.msra.mxu0 %v321_v56  ;;  %v462_v0 = vsel %vm159_vm12, 1.0, %v626_v12 }
  0x24   :  { %vm227_vm13 = vcmp.eq.s32.totalorder %v659_v5, %v687_v18  ;;  %vm261_vm14 = vcmp.eq.s32.totalorder %v659_v5, %v692_v20  ;;  %511 = vmatpush.msra.mxu3 %v321_v56  ;;  %v149_v3 = vadd.f32 %v454_v62, %v115_v61  ;;  %v470_v4 = vsel %vm193_vm10, 1.0, %v626_v12  ;;  %509 = vmatpush.msra.mxu1 %v321_v56 }
  0x25   :  { %v252_v2 = vadd.f32 %v479_v54, %v218_v59  ;;  %vm295_vm15 = vcmp.eq.s32.totalorder %v659_v5, %v699_v23  ;;  %v478_v13 = vsel %vm227_vm13, 1.0, %v626_v12  ;;  %vm56_vm0 = vcmp.eq.s32.totalorder %v662_v6, %v667_v8 }
  0x26   :  { %vm90_vm1 = vcmp.eq.s32.totalorder %v662_v6, %v669_v9  ;;  %vm124_vm2 = vcmp.eq.s32.totalorder %v662_v6, %v671_v10  ;;  %v183_v16 = vadd.f32 %v462_v0, %v149_v3  ;;  %v437_v17 = vsel %vm56_vm0, 1.0, %v626_v12 }
  0x27   :  { %v286_v15 = vadd.f32 %v487_v60, %v252_v2  ;;  %v445_v19 = vsel %vm90_vm1, 1.0, %v626_v12  ;;  %v453_v22 = vsel %vm124_vm2, 1.0, %v626_v12  ;;  %vm158_vm3 = vcmp.eq.s32.totalorder %v662_v6, %v674_v11 }
  0x28   :  { %v114_v21 = vadd.f32 %v445_v19, %v437_v17  ;;  %vm192_vm4 = vcmp.eq.s32.totalorder %v662_v6, %v681_v14  ;;  %v217_v25 = vadd.f32 %v470_v4, %v183_v16  ;;  %v486_v26 = vsel %vm261_vm14, 1.0, %v626_v12 }
  0x29   :  { %v320_v24 = vadd.f32 %v495_v63, %v286_v15  ;;  %v461_v27 = vsel %vm158_vm3, 1.0, %v626_v12  ;;  %v494_v28 = vsel %vm295_vm15, 1.0, %v626_v12  ;;  %v469_v30 = vsel %vm192_vm4, 1.0, %v626_v12 }
  0x2a   :  { %v148_v29 = vadd.f32 %v453_v22, %v114_v21  ;;  %vm226_vm5 = vcmp.eq.s32.totalorder %v662_v6, %v687_v18  ;;  %v251_v31 = vadd.f32 %v478_v13, %v217_v25  ;;  %vm260_vm6 = vcmp.eq.s32.totalorder %v662_v6, %v692_v20 }
  0x2b   :  { %513 = vmatpush.msra.mxu2 %v320_v24  ;;  %366 = vmatpush.msra.mxu0 %v320_v24  ;;  %v477_v32 = vsel %vm226_vm5, 1.0, %v626_v12  ;;  %vm294_vm7 = vcmp.eq.s32.totalorder %v662_v6, %v699_v23  ;;  %vm55_vm8 = vcmp.eq.s32.totalorder %v665_v7, %v667_v8  ;;  %vm89_vm9 = vcmp.eq.s32.totalorder %v665_v7, %v669_v9 }
  0x2c   :  { %514 = vmatpush.msra.mxu3 %v320_v24  ;;  %v182_v5 = vadd.f32 %v461_v27, %v148_v29  ;;  %vm123_vm11 = vcmp.eq.s32.totalorder %v665_v7, %v671_v10  ;;  %v285_v33 = vadd.f32 %v486_v26, %v251_v31  ;;  %v436_v34 = vsel %vm55_vm8, 1.0, %v626_v12  ;;  %512 = vmatpush.msra.mxu1 %v320_v24  ;;  %v327_v27 = vld [vmem:[#allocation5 + $0x20] sm:$0xff]  ;;  %v330_v29 = vld [vmem:[#allocation5 + $0x38] sm:$0xff] }
  0x2d   :  { %v444_v35 = vsel %vm89_vm9, 1.0, %v626_v12  ;;  %v452_v36 = vsel %vm123_vm11, 1.0, %v626_v12  ;;  %vm157_vm12 = vcmp.eq.s32.totalorder %v665_v7, %v674_v11  ;;  %vm191_vm10 = vcmp.eq.s32.totalorder %v665_v7, %v681_v14 }
  0x2e   :  { %v216_v37 = vadd.f32 %v469_v30, %v182_v5  ;;  %v113_v38 = vadd.f32 %v444_v35, %v436_v34  ;;  %v319_v39 = vadd.f32 %v494_v28, %v285_v33  ;;  %v485_v40 = vsel %vm260_vm6, 1.0, %v626_v12  ;;  %v329_v28 = vld [vmem:[#allocation5 + $0x30] sm:$0xff]  ;;  %v326_v30 = vld [vmem:[#allocation5 + $0x18] sm:$0xff] }
  0x2f   :  { %v460_v41 = vsel %vm157_vm12, 1.0, %v626_v12  ;;  %vm225_vm13 = vcmp.eq.s32.totalorder %v665_v7, %v687_v18  ;;  %v493_v43 = vsel %vm294_vm7, 1.0, %v626_v12  ;;  %v468_v45 = vsel %vm191_vm10, 1.0, %v626_v12 }
  0x30   :  { %v250_v42 = vadd.f32 %v477_v32, %v216_v37  ;;  %v147_v44 = vadd.f32 %v452_v36, %v113_v38  ;;  %516 = vmatpush.msra.mxu2 %v319_v39  ;;  %367 = vmatpush.msra.mxu0 %v319_v39  ;;  %v476_v46 = vsel %vm225_vm13, 1.0, %v626_v12  ;;  %vm259_vm14 = vcmp.eq.s32.totalorder %v665_v7, %v692_v20 }
  0x31   :  { %vm54_vm15 = vcmp.eq.s32.totalorder %v747_v51, %v667_v8  ;;  %vm88_vm0 = vcmp.eq.s32.totalorder %v747_v51, %v669_v9  ;;  %517 = vmatpush.msra.mxu3 %v319_v39  ;;  %vm293_vm1 = vcmp.eq.s32.totalorder %v665_v7, %v699_v23  ;;  %515 = vmatpush.msra.mxu1 %v319_v39  ;;  %v484_v55 = vsel %vm259_vm14, 1.0, %v626_v12 }
  0x32   :  { %v284_v47 = vadd.f32 %v485_v40, %v250_v42  ;;  %v181_v6 = vadd.f32 %v460_v41, %v147_v44  ;;  %v435_v48 = vsel %vm54_vm15, 1.0, %v626_v12  ;;  %v443_v49 = vsel %vm88_vm0, 1.0, %v626_v12 }
  0x33   :  { %vm122_vm2 = vcmp.eq.s32.totalorder %v747_v51, %v671_v10  ;;  %vm156_vm3 = vcmp.eq.s32.totalorder %v747_v51, %v674_v11  ;;  %vm190_vm4 = vcmp.eq.s32.totalorder %v747_v51, %v681_v14  ;;  %v112_v53 = vadd.f32 %v443_v49, %v435_v48 }
  0x34   :  { %v318_v50 = vadd.f32 %v493_v43, %v284_v47  ;;  %v215_v52 = vadd.f32 %v468_v45, %v181_v6  ;;  %v451_v54 = vsel %vm122_vm2, 1.0, %v626_v12  ;;  %v459_v56 = vsel %vm156_vm3, 1.0, %v626_v12 }
  0x35   :  { %vm224_vm5 = vcmp.eq.s32.totalorder %v747_v51, %v687_v18  ;;  %v492_v58 = vsel %vm293_vm1, 1.0, %v626_v12  ;;  %v146_v59 = vadd.f32 %v451_v54, %v112_v53  ;;  %v467_v60 = vsel %vm190_vm4, 1.0, %v626_v12 }
  0x36   :  { %519 = vmatpush.msra.mxu2 %v318_v50  ;;  %v249_v57 = vadd.f32 %v476_v46, %v215_v52  ;;  %368 = vmatpush.msra.mxu0 %v318_v50  ;;  %vm258_vm6 = vcmp.eq.s32.totalorder %v747_v51, %v692_v20  ;;  %vm53_vm7 = vcmp.eq.s32.totalorder %v649_v1, %v667_v8  ;;  %v475_v62 = vsel %vm224_vm5, 1.0, %v626_v12 }
  0x37   :  { %520 = vmatpush.msra.mxu3 %v318_v50  ;;  %vm87_vm8 = vcmp.eq.s32.totalorder %v649_v1, %v669_v9  ;;  %vm121_vm9 = vcmp.eq.s32.totalorder %v649_v1, %v671_v10  ;;  %v180_v7 = vadd.f32 %v459_v56, %v146_v59  ;;  %v434_v63 = vsel %vm53_vm7, 1.0, %v626_v12  ;;  %518 = vmatpush.msra.mxu1 %v318_v50 }
  0x38   :  { %v283_v61 = vadd.f32 %v484_v55, %v249_v57  ;;  %vm292_vm11 = vcmp.eq.s32.totalorder %v747_v51, %v699_v23  ;;  %v442_v0 = vsel %vm87_vm8, 1.0, %v626_v12  ;;  %v450_v8 = vsel %vm121_vm9, 1.0, %v626_v12 }
  0x39   :  { %vm155_vm12 = vcmp.eq.s32.totalorder %v649_v1, %v674_v11  ;;  %v214_v2 = vadd.f32 %v467_v60, %v180_v7  ;;  %v111_v10 = vadd.f32 %v442_v0, %v434_v63  ;;  %vm189_vm10 = vcmp.eq.s32.totalorder %v649_v1, %v681_v14 }
  0x3a   :  { %v317_v9 = vadd.f32 %v492_v58, %v283_v61  ;;  %v483_v3 = vsel %vm258_vm6, 1.0, %v626_v12  ;;  %v458_v4 = vsel %vm155_vm12, 1.0, %v626_v12  ;;  %vm223_vm13 = vcmp.eq.s32.totalorder %v649_v1, %v687_v18 }
  0x3b   :  { %v248_v13 = vadd.f32 %v475_v62, %v214_v2  ;;  %v145_v15 = vadd.f32 %v450_v8, %v111_v10  ;;  %v491_v11 = vsel %vm292_vm11, 1.0, %v626_v12  ;;  %v466_v16 = vsel %vm189_vm10, 1.0, %v626_v12 }
  0x3c   :  { %522 = vmatpush.msra.mxu2 %v317_v9  ;;  %369 = vmatpush.msra.mxu0 %v317_v9  ;;  %vm257_vm14 = vcmp.eq.s32.totalorder %v649_v1, %v692_v20  ;;  %v474_v51 = vsel %vm223_vm13, 1.0, %v626_v12  ;;  %vm291_vm15 = vcmp.eq.s32.totalorder %v649_v1, %v699_v23  ;;  %vm331_vm0 = vcmask 523264   ;;  %v323_v20 = vld [vmem:[#allocation5] sm:$0xff]  ;;  %v325_v1 = vld [vmem:[#allocation5 + $0x10] sm:$0xff]  ;;  %v324_v23 = vld [vmem:[#allocation5 + $0x8] sm:$0xff] }
  0x3d   :  { %523 = vmatpush.msra.mxu3 %v317_v9  ;;  %521 = vmatpush.msra.mxu1 %v317_v9  ;;  %v282_v14 = vadd.f32 %v483_v3, %v248_v13  ;;  %v179_v17 = vadd.f32 %v458_v4, %v145_v15  ;;  %v482_v18 = vsel %vm257_vm14, 1.0, %v626_v12  ;;  %v490_v24 = vsel %vm291_vm15, 1.0, %v626_v12  ;;  %v328_v12 = vld [vmem:[#allocation5 + $0x28] sm:$0xff] }
  0x3f   :  { %v316_v19 = vadd.f32 %v491_v11, %v282_v14  ;;  %v213_v21 = vadd.f32 %v466_v16, %v179_v17 }
  0x41   :  { %525 = vmatpush.msra.mxu2 %v316_v19  ;;  %v247_v22 = vadd.f32 %v474_v51, %v213_v21  ;;  %370 = vmatpush.msra.mxu0 %v316_v19 }
  0x42   :  { %526 = vmatpush.msra.mxu3 %v316_v19  ;;  %524 = vmatpush.msra.mxu1 %v316_v19 }
  0x43   :  { %v281_v25 = vadd.f32 %v482_v18, %v247_v22 }
  0x45   :  { %v315_v26 = vadd.f32 %v490_v24, %v281_v25 }
  0x47   :  { %528 = vmatpush.msra.mxu2 %v315_v26  ;;  %371 = vmatpush.msra.mxu0 %v315_v26 }
  0x48   :  { %502 = vmatmul.msk.f32.vlgmr.msra.gmra.mxu2 %vm331_vm0, %v327_v27  ;;  %529 = vmatpush.msra.mxu3 %v315_v26 }
  0x49   :  { %498 = vmatmul.msk.f32.vlgmr.msra.gmra.mxu0 %vm331_vm0, %v323_v20  ;;  %504 = vmatmul.msk.f32.vlgmr.msra.gmra.mxu3 %vm331_vm0, %v329_v28 }
  0x4a   :  { %527 = vmatpush.msra.mxu1 %v315_v26 }
  0x4b   :  { %500 = vmatmul.msk.f32.vlgmr.msra.gmra.mxu1 %vm331_vm0, %v325_v1 }
  0x50   :  { %503 = vmatmul.msk.f32.gmra.mxu2 %vm331_vm0, %v328_v12 }
  0x51   :  { %499 = vmatmul.msk.f32.gmra.mxu0 %vm331_vm0, %v324_v23  ;;  %505 = vmatmul.msk.f32.gmra.mxu3 %vm331_vm0, %v330_v29 }
  0x53   :  { %501 = vmatmul.msk.f32.gmra.mxu1 %vm331_vm0, %v326_v30 }
  0xc6   :  { %v373_v31 = vpop.f32.mrf.mxu0 }
  0xc7   :  { %v397_v35 = vmul.f32 %v373_v31, %v373_v31 }
  0xc8   :  { %v379_v32 = vpop.f32.mrf.mxu1 }
  0xc9   :  { %v399_v38 = vmul.f32 %v379_v32, %v379_v32 }
  0xcb   :  { %v385_v5 = vpop.f32.mrf.mxu2 }
  0xcc   :  { %v391_v33 = vpop.f32.mrf.mxu3  ;;  %v401_v41 = vsub.f32 %v397_v35, %v385_v5 }
  0xcd   :  { %v403_v44 = vsub.f32 %v399_v38, %v391_v33 }
  0xce   :  { %v376_v34 = vpop.f32.mrf.mxu0 }
  0xcf   :  { %v398_v36 = vmul.f32 %v376_v34, %v376_v34 }
  0xd0   :  { %v382_v37 = vpop.f32.mrf.mxu1 }
  0xd1   :  { %v400_v39 = vmul.f32 %v382_v37, %v382_v37 }
  0xd3   :  { %v388_v40 = vpop.f32.mrf.mxu2 }
  0xd4   :  { %v402_v42 = vsub.f32 %v398_v36, %v388_v40  ;;  %v394_v43 = vpop.f32.mrf.mxu3 }
  0xd5   :  { %v404_v46 = vsub.f32 %v400_v39, %v394_v43 }
  0xd6   :  { %v405_v45 = vadd.f32 %v402_v42, %v401_v41 }
  0xd8   :  { %v406_v47 = vadd.f32 %v405_v45, %v403_v44 }
  0xda   :  { %v407_v6 = vadd.f32 %v406_v47, %v404_v46 }
  0xdc   :  { %v408_v48 = vrot.slane %v407_v6, 4 }
  0xde   :  { %v409_v49 = vadd.f32 %v408_v48, %v407_v6 }
  0xe0   :  { %v410_v50 = vrot.slane %v409_v49, 2 }
  0xe2   :  { %v411_v52 = vadd.f32 %v410_v50, %v409_v49 }
  0xe4   :  { %v412_v53 = vrot.slane %v411_v52, 1 }
  0xe6   :  { %v413_v54 = vadd.f32 %v412_v53, %v411_v52 }
  0xe8   :  { %v414_v55 = vmul.f32 0.5, %v413_v54 }
  0xea   :  { %415 = vst [vmem:[#allocation7] sm:$0x1] %v414_v55 }
  0xeb   :  { %426 = dma.vmem_to_hbm [thread:$0]  %s422_s1, 16, %s424_s23, [#allocation4]  }
  0xec   :  { %620 = dma.done.wait [#allocation4], 16  }
  0xed   :  { %621 = vsyncadd [#allocation4], 4294967280 }
  0xee   :  { %431 = vsyncpa [#allocation3], 1 }
  0xef   :  { %432 = vsyncpa [#allocation6], 1 }
  0xf0   :  { %433 = vsyncpa [#allocation4], 1 }

</bundles_post_ra>
